<compile_context>
chip_gen: v7x
topology: tpu7x:2x2x1
jax: 0.10.0
libtpu: 0.0.40
codegen_flags: <defaults>
</compile_context>

<pallas_src>
import numpy as np

import jax
import jax.numpy as jnp
from jax.experimental import pallas as pl
from jax.experimental.pallas import tpu as pltpu

# Layer widths of AE_big(n_features=4): encoder 4->8->6->4->3, decoder 3->4->6->8->4
LAYER_DIMS = [4, 8, 6, 4, 3, 4, 6, 8, 4]
_N_LAYERS = len(LAYER_DIMS) - 1
_PAD = 8          # all feature dims padded to 8 (sublane axis)
_BIAS_COL = _PAD  # bias lives in lane column 8 of the packed param buffer


def _ae_kernel(x_ref, p_ref, o_ref):
    """Full forward pass on one (features, batch_tile) block.

    x_ref: (4, tn) f32, batch on the lane axis.
    p_ref: (8, 8, 9) f32 packed params; p[li, :dout, :din] = W_torch (out, in),
           p[li, :dout, 8] = bias. Zero-padded elsewhere.
    o_ref: (4, tn) output block.
    """
    h = x_ref[...]                                   # (4, tn) float32
    for li in range(_N_LAYERS):
        d_in = LAYER_DIMS[li]
        # y[o, n] = sum_k W[o, k] * h[k, n] + b[o]  -- unrolled VPU FMAs.
        # (8,1) weight column broadcasts over lanes, (1,tn) activation row
        # broadcasts over sublanes; no MXU pass, no result-FIFO latency.
        acc = p_ref[li, :, 0:1] * h[0:1, :]          # (8, tn)
        for k in range(1, d_in):
            acc = acc + p_ref[li, :, k:k + 1] * h[k:k + 1, :]
        acc = acc + p_ref[li, :, _BIAS_COL:_BIAS_COL + 1]   # + bias (8,1)
        if li != _N_LAYERS - 1:                      # tanh after every layer but the last
            h = jnp.tanh(acc)
        else:
            h = acc
    o_ref[...] = h[:LAYER_DIMS[-1], :].astype(o_ref.dtype)


def pack_params(weights, biases):
    """weights[i]: torch layout (out_i, in_i); biases[i]: (out_i,).
    Returns a single zero-padded (n_layers, 8, 9) f32 buffer."""
    p = np.zeros((_N_LAYERS, _PAD, _PAD + 1), np.float32)
    for li, (w, b) in enumerate(zip(weights, biases)):
        d_out, d_in = w.shape
        p[li, :d_out, :d_in] = np.asarray(w)
        p[li, :d_out, _BIAS_COL] = np.asarray(b)
    return jnp.asarray(p)


def ae_big_forward(x, packed_params, *, tile_n=2048):
    """x: (B, 4) float32. packed_params: (8, 8, 9) from pack_params.
    Returns (B, 4), identical semantics to AE_big.forward."""
    B, F = x.shape
    assert F == LAYER_DIMS[0]
    F_out = LAYER_DIMS[-1]

    # Batch-on-lanes layout: (features, batch); pad batch to a multiple of 128.
    xt = jnp.transpose(x).astype(jnp.float32)        # (4, B)
    Bp = pl.cdiv(B, 128) * 128
    tn = min(tile_n, Bp)
    # Prefer >= 2 grid steps so both TensorCores get work on v7x.
    if Bp // tn < 2 and Bp >= 256:
        tn = max(128, ((Bp // 2) // 128) * 128)
    Bp = pl.cdiv(Bp, tn) * tn
    if Bp != B:
        xt = jnp.pad(xt, ((0, 0), (0, Bp - B)))

    grid = (Bp // tn,)
    out_t = pl.pallas_call(
        _ae_kernel,
        out_shape=jax.ShapeDtypeStruct((F_out, Bp), x.dtype),
        grid_spec=pltpu.PrefetchScalarGridSpec(
            num_scalar_prefetch=0,
            grid=grid,
            in_specs=[
                # activations: lane-dense batch tiles
                pl.BlockSpec((F, tn), lambda i: (0, i)),
                # all weights + biases: one small resident buffer
                pl.BlockSpec(packed_params.shape, lambda i: (0, 0, 0)),
            ],
            out_specs=pl.BlockSpec((F_out, tn), lambda i: (0, i)),
        ),
        compiler_params=pltpu.CompilerParams(
            dimension_semantics=("parallel",),
            vmem_limit_bytes=32 * 1024 * 1024,   # portable across v5e/v6e/v7x
        ),
    )(xt, packed_params)

    return jnp.transpose(out_t[:, :B])


def init_params(key):
    """Deterministic synthetic params in PyTorch nn.Linear layout: W (out, in), b (out,)."""
    weights, biases = [], []
    for li in range(_N_LAYERS):
        d_in, d_out = LAYER_DIMS[li], LAYER_DIMS[li + 1]
        key, kw, kb = jax.random.split(key, 3)
        bound = 1.0 / float(d_in) ** 0.5             # PyTorch default uniform bound
        weights.append(jax.random.uniform(kw, (d_out, d_in), jnp.float32, -bound, bound))
        biases.append(jax.random.uniform(kb, (d_out,), jnp.float32, -bound, bound))
    return weights, biases


def reference_forward(x, weights, biases):
    """Plain-JAX reference mirroring AE_big.forward (torch-layout weights)."""
    h = x
    for li, (w, b) in enumerate(zip(weights, biases)):
        h = h @ w.T + b
        if li != _N_LAYERS - 1:
            h = jnp.tanh(h)
    return h


if __name__ == "__main__":
    key = jax.random.PRNGKey(0)
    key, kx = jax.random.split(key)

    B = 256  # padded/tiled along the lane axis inside the kernel (2 grid steps here)
    x = jax.random.normal(kx, (B, LAYER_DIMS[0]), dtype=jnp.float32)

    weights, biases = init_params(key)
    packed = pack_params(weights, biases)

    out = ae_big_forward(x, packed)
    out = jax.block_until_ready(out)

    ref = reference_forward(x, weights, biases)
    assert out.shape == (B, LAYER_DIMS[-1])
    assert jnp.allclose(out, ref, atol=1e-5, rtol=1e-5), "mismatch vs reference"

    print("KERNEL_OK")
</pallas_src>

<mosaic_0001>
module attributes {stable_mosaic.version = 11 : i64} {
  func.func @_ae_kernel(%arg0: i32, %arg1: memref<4x128xf32, #tpu.memory_space<vmem>>, %arg2: memref<8x8x9xf32, #tpu.memory_space<vmem>>, %arg3: memref<4x128xf32, #tpu.memory_space<vmem>>) attributes {dimension_semantics = [#tpu.dimension_semantics<parallel>], iteration_bounds = array<i64: 2>, scalar_prefetch = 0 : i64, scratch_operands = 0 : i64, tpu.core_type = #tpu.core_type<tc>, window_params = [{transform_indices = @transform_0, window_bounds = array<i64: 4, 128>}, {pipeline_mode = #tpu.pipeline_mode<synchronous>, transform_indices = @transform_1, window_bounds = array<i64: 8, 8, 9>}, {transform_indices = @transform_2, window_bounds = array<i64: 4, 128>}]} {
    %c0 = arith.constant 0 : index
    %c0_0 = arith.constant 0 : index
    %0 = vector.load %arg1[%c0, %c0_0] : memref<4x128xf32, #tpu.memory_space<vmem>>, vector<4x128xf32>
    %c0_1 = arith.constant 0 : index
    %c0_2 = arith.constant 0 : index
    %c0_3 = arith.constant 0 : index
    %1 = vector.load %arg2[%c0_1, %c0_2, %c0_3] : memref<8x8x9xf32, #tpu.memory_space<vmem>>, vector<1x8x1xf32>
    %2 = vector.shape_cast %1 : vector<1x8x1xf32> to vector<8x1xf32>
    %3 = vector.extract_strided_slice %0 {offsets = [0, 0], sizes = [1, 128], strides = [1, 1]} : vector<4x128xf32> to vector<1x128xf32>
    %4 = vector.broadcast %2 : vector<8x1xf32> to vector<8x128xf32>
    %5 = vector.broadcast %3 : vector<1x128xf32> to vector<8x128xf32>
    %6 = arith.mulf %4, %5 : vector<8x128xf32>
    %c0_4 = arith.constant 0 : index
    %c0_5 = arith.constant 0 : index
    %c1 = arith.constant 1 : index
    %7 = vector.load %arg2[%c0_4, %c0_5, %c1] : memref<8x8x9xf32, #tpu.memory_space<vmem>>, vector<1x8x1xf32>
    %8 = vector.shape_cast %7 : vector<1x8x1xf32> to vector<8x1xf32>
    %9 = vector.extract_strided_slice %0 {offsets = [1, 0], sizes = [1, 128], strides = [1, 1]} : vector<4x128xf32> to vector<1x128xf32>
    %10 = vector.broadcast %8 : vector<8x1xf32> to vector<8x128xf32>
    %11 = vector.broadcast %9 : vector<1x128xf32> to vector<8x128xf32>
    %12 = arith.mulf %10, %11 : vector<8x128xf32>
    %13 = arith.addf %6, %12 : vector<8x128xf32>
    %c0_6 = arith.constant 0 : index
    %c0_7 = arith.constant 0 : index
    %c2 = arith.constant 2 : index
    %14 = vector.load %arg2[%c0_6, %c0_7, %c2] : memref<8x8x9xf32, #tpu.memory_space<vmem>>, vector<1x8x1xf32>
    %15 = vector.shape_cast %14 : vector<1x8x1xf32> to vector<8x1xf32>
    %16 = vector.extract_strided_slice %0 {offsets = [2, 0], sizes = [1, 128], strides = [1, 1]} : vector<4x128xf32> to vector<1x128xf32>
    %17 = vector.broadcast %15 : vector<8x1xf32> to vector<8x128xf32>
    %18 = vector.broadcast %16 : vector<1x128xf32> to vector<8x128xf32>
    %19 = arith.mulf %17, %18 : vector<8x128xf32>
    %20 = arith.addf %13, %19 : vector<8x128xf32>
    %c0_8 = arith.constant 0 : index
    %c0_9 = arith.constant 0 : index
    %c3 = arith.constant 3 : index
    %21 = vector.load %arg2[%c0_8, %c0_9, %c3] : memref<8x8x9xf32, #tpu.memory_space<vmem>>, vector<1x8x1xf32>
    %22 = vector.shape_cast %21 : vector<1x8x1xf32> to vector<8x1xf32>
    %23 = vector.extract_strided_slice %0 {offsets = [3, 0], sizes = [1, 128], strides = [1, 1]} : vector<4x128xf32> to vector<1x128xf32>
    %24 = vector.broadcast %22 : vector<8x1xf32> to vector<8x128xf32>
    %25 = vector.broadcast %23 : vector<1x128xf32> to vector<8x128xf32>
    %26 = arith.mulf %24, %25 : vector<8x128xf32>
    %27 = arith.addf %20, %26 : vector<8x128xf32>
    %c0_10 = arith.constant 0 : index
    %c0_11 = arith.constant 0 : index
    %c8 = arith.constant 8 : index
    %28 = vector.load %arg2[%c0_10, %c0_11, %c8] : memref<8x8x9xf32, #tpu.memory_space<vmem>>, vector<1x8x1xf32>
    %29 = vector.shape_cast %28 : vector<1x8x1xf32> to vector<8x1xf32>
    %30 = vector.broadcast %29 : vector<8x1xf32> to vector<8x128xf32>
    %31 = arith.addf %27, %30 : vector<8x128xf32>
    %32 = math.tanh %31 : vector<8x128xf32>
    %c1_12 = arith.constant 1 : index
    %c0_13 = arith.constant 0 : index
    %c0_14 = arith.constant 0 : index
    %33 = vector.load %arg2[%c1_12, %c0_13, %c0_14] : memref<8x8x9xf32, #tpu.memory_space<vmem>>, vector<1x8x1xf32>
    %34 = vector.shape_cast %33 : vector<1x8x1xf32> to vector<8x1xf32>
    %35 = vector.extract_strided_slice %32 {offsets = [0, 0], sizes = [1, 128], strides = [1, 1]} : vector<8x128xf32> to vector<1x128xf32>
    %36 = vector.broadcast %34 : vector<8x1xf32> to vector<8x128xf32>
    %37 = vector.broadcast %35 : vector<1x128xf32> to vector<8x128xf32>
    %38 = arith.mulf %36, %37 : vector<8x128xf32>
    %c1_15 = arith.constant 1 : index
    %c0_16 = arith.constant 0 : index
    %c1_17 = arith.constant 1 : index
    %39 = vector.load %arg2[%c1_15, %c0_16, %c1_17] : memref<8x8x9xf32, #tpu.memory_space<vmem>>, vector<1x8x1xf32>
    %40 = vector.shape_cast %39 : vector<1x8x1xf32> to vector<8x1xf32>
    %41 = vector.extract_strided_slice %32 {offsets = [1, 0], sizes = [1, 128], strides = [1, 1]} : vector<8x128xf32> to vector<1x128xf32>
    %42 = vector.broadcast %40 : vector<8x1xf32> to vector<8x128xf32>
    %43 = vector.broadcast %41 : vector<1x128xf32> to vector<8x128xf32>
    %44 = arith.mulf %42, %43 : vector<8x128xf32>
    %45 = arith.addf %38, %44 : vector<8x128xf32>
    %c1_18 = arith.constant 1 : index
    %c0_19 = arith.constant 0 : index
    %c2_20 = arith.constant 2 : index
    %46 = vector.load %arg2[%c1_18, %c0_19, %c2_20] : memref<8x8x9xf32, #tpu.memory_space<vmem>>, vector<1x8x1xf32>
    %47 = vector.shape_cast %46 : vector<1x8x1xf32> to vector<8x1xf32>
    %48 = vector.extract_strided_slice %32 {offsets = [2, 0], sizes = [1, 128], strides = [1, 1]} : vector<8x128xf32> to vector<1x128xf32>
    %49 = vector.broadcast %47 : vector<8x1xf32> to vector<8x128xf32>
    %50 = vector.broadcast %48 : vector<1x128xf32> to vector<8x128xf32>
    %51 = arith.mulf %49, %50 : vector<8x128xf32>
    %52 = arith.addf %45, %51 : vector<8x128xf32>
    %c1_21 = arith.constant 1 : index
    %c0_22 = arith.constant 0 : index
    %c3_23 = arith.constant 3 : index
    %53 = vector.load %arg2[%c1_21, %c0_22, %c3_23] : memref<8x8x9xf32, #tpu.memory_space<vmem>>, vector<1x8x1xf32>
    %54 = vector.shape_cast %53 : vector<1x8x1xf32> to vector<8x1xf32>
    %55 = vector.extract_strided_slice %32 {offsets = [3, 0], sizes = [1, 128], strides = [1, 1]} : vector<8x128xf32> to vector<1x128xf32>
    %56 = vector.broadcast %54 : vector<8x1xf32> to vector<8x128xf32>
    %57 = vector.broadcast %55 : vector<1x128xf32> to vector<8x128xf32>
    %58 = arith.mulf %56, %57 : vector<8x128xf32>
    %59 = arith.addf %52, %58 : vector<8x128xf32>
    %c1_24 = arith.constant 1 : index
    %c0_25 = arith.constant 0 : index
    %c4 = arith.constant 4 : index
    %60 = vector.load %arg2[%c1_24, %c0_25, %c4] : memref<8x8x9xf32, #tpu.memory_space<vmem>>, vector<1x8x1xf32>
    %61 = vector.shape_cast %60 : vector<1x8x1xf32> to vector<8x1xf32>
    %62 = vector.extract_strided_slice %32 {offsets = [4, 0], sizes = [1, 128], strides = [1, 1]} : vector<8x128xf32> to vector<1x128xf32>
    %63 = vector.broadcast %61 : vector<8x1xf32> to vector<8x128xf32>
    %64 = vector.broadcast %62 : vector<1x128xf32> to vector<8x128xf32>
    %65 = arith.mulf %63, %64 : vector<8x128xf32>
    %66 = arith.addf %59, %65 : vector<8x128xf32>
    %c1_26 = arith.constant 1 : index
    %c0_27 = arith.constant 0 : index
    %c5 = arith.constant 5 : index
    %67 = vector.load %arg2[%c1_26, %c0_27, %c5] : memref<8x8x9xf32, #tpu.memory_space<vmem>>, vector<1x8x1xf32>
    %68 = vector.shape_cast %67 : vector<1x8x1xf32> to vector<8x1xf32>
    %69 = vector.extract_strided_slice %32 {offsets = [5, 0], sizes = [1, 128], strides = [1, 1]} : vector<8x128xf32> to vector<1x128xf32>
    %70 = vector.broadcast %68 : vector<8x1xf32> to vector<8x128xf32>
    %71 = vector.broadcast %69 : vector<1x128xf32> to vector<8x128xf32>
    %72 = arith.mulf %70, %71 : vector<8x128xf32>
    %73 = arith.addf %66, %72 : vector<8x128xf32>
    %c1_28 = arith.constant 1 : index
    %c0_29 = arith.constant 0 : index
    %c6 = arith.constant 6 : index
    %74 = vector.load %arg2[%c1_28, %c0_29, %c6] : memref<8x8x9xf32, #tpu.memory_space<vmem>>, vector<1x8x1xf32>
    %75 = vector.shape_cast %74 : vector<1x8x1xf32> to vector<8x1xf32>
    %76 = vector.extract_strided_slice %32 {offsets = [6, 0], sizes = [1, 128], strides = [1, 1]} : vector<8x128xf32> to vector<1x128xf32>
    %77 = vector.broadcast %75 : vector<8x1xf32> to vector<8x128xf32>
    %78 = vector.broadcast %76 : vector<1x128xf32> to vector<8x128xf32>
    %79 = arith.mulf %77, %78 : vector<8x128xf32>
    %80 = arith.addf %73, %79 : vector<8x128xf32>
    %c1_30 = arith.constant 1 : index
    %c0_31 = arith.constant 0 : index
    %c7 = arith.constant 7 : index
    %81 = vector.load %arg2[%c1_30, %c0_31, %c7] : memref<8x8x9xf32, #tpu.memory_space<vmem>>, vector<1x8x1xf32>
    %82 = vector.shape_cast %81 : vector<1x8x1xf32> to vector<8x1xf32>
    %83 = vector.extract_strided_slice %32 {offsets = [7, 0], sizes = [1, 128], strides = [1, 1]} : vector<8x128xf32> to vector<1x128xf32>
    %84 = vector.broadcast %82 : vector<8x1xf32> to vector<8x128xf32>
    %85 = vector.broadcast %83 : vector<1x128xf32> to vector<8x128xf32>
    %86 = arith.mulf %84, %85 : vector<8x128xf32>
    %87 = arith.addf %80, %86 : vector<8x128xf32>
    %c1_32 = arith.constant 1 : index
    %c0_33 = arith.constant 0 : index
    %c8_34 = arith.constant 8 : index
    %88 = vector.load %arg2[%c1_32, %c0_33, %c8_34] : memref<8x8x9xf32, #tpu.memory_space<vmem>>, vector<1x8x1xf32>
    %89 = vector.shape_cast %88 : vector<1x8x1xf32> to vector<8x1xf32>
    %90 = vector.broadcast %89 : vector<8x1xf32> to vector<8x128xf32>
    %91 = arith.addf %87, %90 : vector<8x128xf32>
    %92 = math.tanh %91 : vector<8x128xf32>
    %c2_35 = arith.constant 2 : index
    %c0_36 = arith.constant 0 : index
    %c0_37 = arith.constant 0 : index
    %93 = vector.load %arg2[%c2_35, %c0_36, %c0_37] : memref<8x8x9xf32, #tpu.memory_space<vmem>>, vector<1x8x1xf32>
    %94 = vector.shape_cast %93 : vector<1x8x1xf32> to vector<8x1xf32>
    %95 = vector.extract_strided_slice %92 {offsets = [0, 0], sizes = [1, 128], strides = [1, 1]} : vector<8x128xf32> to vector<1x128xf32>
    %96 = vector.broadcast %94 : vector<8x1xf32> to vector<8x128xf32>
    %97 = vector.broadcast %95 : vector<1x128xf32> to vector<8x128xf32>
    %98 = arith.mulf %96, %97 : vector<8x128xf32>
    %c2_38 = arith.constant 2 : index
    %c0_39 = arith.constant 0 : index
    %c1_40 = arith.constant 1 : index
    %99 = vector.load %arg2[%c2_38, %c0_39, %c1_40] : memref<8x8x9xf32, #tpu.memory_space<vmem>>, vector<1x8x1xf32>
    %100 = vector.shape_cast %99 : vector<1x8x1xf32> to vector<8x1xf32>
    %101 = vector.extract_strided_slice %92 {offsets = [1, 0], sizes = [1, 128], strides = [1, 1]} : vector<8x128xf32> to vector<1x128xf32>
    %102 = vector.broadcast %100 : vector<8x1xf32> to vector<8x128xf32>
    %103 = vector.broadcast %101 : vector<1x128xf32> to vector<8x128xf32>
    %104 = arith.mulf %102, %103 : vector<8x128xf32>
    %105 = arith.addf %98, %104 : vector<8x128xf32>
    %c2_41 = arith.constant 2 : index
    %c0_42 = arith.constant 0 : index
    %c2_43 = arith.constant 2 : index
    %106 = vector.load %arg2[%c2_41, %c0_42, %c2_43] : memref<8x8x9xf32, #tpu.memory_space<vmem>>, vector<1x8x1xf32>
    %107 = vector.shape_cast %106 : vector<1x8x1xf32> to vector<8x1xf32>
    %108 = vector.extract_strided_slice %92 {offsets = [2, 0], sizes = [1, 128], strides = [1, 1]} : vector<8x128xf32> to vector<1x128xf32>
    %109 = vector.broadcast %107 : vector<8x1xf32> to vector<8x128xf32>
    %110 = vector.broadcast %108 : vector<1x128xf32> to vector<8x128xf32>
    %111 = arith.mulf %109, %110 : vector<8x128xf32>
    %112 = arith.addf %105, %111 : vector<8x128xf32>
    %c2_44 = arith.constant 2 : index
    %c0_45 = arith.constant 0 : index
    %c3_46 = arith.constant 3 : index
    %113 = vector.load %arg2[%c2_44, %c0_45, %c3_46] : memref<8x8x9xf32, #tpu.memory_space<vmem>>, vector<1x8x1xf32>
    %114 = vector.shape_cast %113 : vector<1x8x1xf32> to vector<8x1xf32>
    %115 = vector.extract_strided_slice %92 {offsets = [3, 0], sizes = [1, 128], strides = [1, 1]} : vector<8x128xf32> to vector<1x128xf32>
    %116 = vector.broadcast %114 : vector<8x1xf32> to vector<8x128xf32>
    %117 = vector.broadcast %115 : vector<1x128xf32> to vector<8x128xf32>
    %118 = arith.mulf %116, %117 : vector<8x128xf32>
    %119 = arith.addf %112, %118 : vector<8x128xf32>
    %c2_47 = arith.constant 2 : index
    %c0_48 = arith.constant 0 : index
    %c4_49 = arith.constant 4 : index
    %120 = vector.load %arg2[%c2_47, %c0_48, %c4_49] : memref<8x8x9xf32, #tpu.memory_space<vmem>>, vector<1x8x1xf32>
    %121 = vector.shape_cast %120 : vector<1x8x1xf32> to vector<8x1xf32>
    %122 = vector.extract_strided_slice %92 {offsets = [4, 0], sizes = [1, 128], strides = [1, 1]} : vector<8x128xf32> to vector<1x128xf32>
    %123 = vector.broadcast %121 : vector<8x1xf32> to vector<8x128xf32>
    %124 = vector.broadcast %122 : vector<1x128xf32> to vector<8x128xf32>
    %125 = arith.mulf %123, %124 : vector<8x128xf32>
    %126 = arith.addf %119, %125 : vector<8x128xf32>
    %c2_50 = arith.constant 2 : index
    %c0_51 = arith.constant 0 : index
    %c5_52 = arith.constant 5 : index
    %127 = vector.load %arg2[%c2_50, %c0_51, %c5_52] : memref<8x8x9xf32, #tpu.memory_space<vmem>>, vector<1x8x1xf32>
    %128 = vector.shape_cast %127 : vector<1x8x1xf32> to vector<8x1xf32>
    %129 = vector.extract_strided_slice %92 {offsets = [5, 0], sizes = [1, 128], strides = [1, 1]} : vector<8x128xf32> to vector<1x128xf32>
    %130 = vector.broadcast %128 : vector<8x1xf32> to vector<8x128xf32>
    %131 = vector.broadcast %129 : vector<1x128xf32> to vector<8x128xf32>
    %132 = arith.mulf %130, %131 : vector<8x128xf32>
    %133 = arith.addf %126, %132 : vector<8x128xf32>
    %c2_53 = arith.constant 2 : index
    %c0_54 = arith.constant 0 : index
    %c8_55 = arith.constant 8 : index
    %134 = vector.load %arg2[%c2_53, %c0_54, %c8_55] : memref<8x8x9xf32, #tpu.memory_space<vmem>>, vector<1x8x1xf32>
    %135 = vector.shape_cast %134 : vector<1x8x1xf32> to vector<8x1xf32>
    %136 = vector.broadcast %135 : vector<8x1xf32> to vector<8x128xf32>
    %137 = arith.addf %133, %136 : vector<8x128xf32>
    %138 = math.tanh %137 : vector<8x128xf32>
    %c3_56 = arith.constant 3 : index
    %c0_57 = arith.constant 0 : index
    %c0_58 = arith.constant 0 : index
    %139 = vector.load %arg2[%c3_56, %c0_57, %c0_58] : memref<8x8x9xf32, #tpu.memory_space<vmem>>, vector<1x8x1xf32>
    %140 = vector.shape_cast %139 : vector<1x8x1xf32> to vector<8x1xf32>
    %141 = vector.extract_strided_slice %138 {offsets = [0, 0], sizes = [1, 128], strides = [1, 1]} : vector<8x128xf32> to vector<1x128xf32>
    %142 = vector.broadcast %140 : vector<8x1xf32> to vector<8x128xf32>
    %143 = vector.broadcast %141 : vector<1x128xf32> to vector<8x128xf32>
    %144 = arith.mulf %142, %143 : vector<8x128xf32>
    %c3_59 = arith.constant 3 : index
    %c0_60 = arith.constant 0 : index
    %c1_61 = arith.constant 1 : index
    %145 = vector.load %arg2[%c3_59, %c0_60, %c1_61] : memref<8x8x9xf32, #tpu.memory_space<vmem>>, vector<1x8x1xf32>
    %146 = vector.shape_cast %145 : vector<1x8x1xf32> to vector<8x1xf32>
    %147 = vector.extract_strided_slice %138 {offsets = [1, 0], sizes = [1, 128], strides = [1, 1]} : vector<8x128xf32> to vector<1x128xf32>
    %148 = vector.broadcast %146 : vector<8x1xf32> to vector<8x128xf32>
    %149 = vector.broadcast %147 : vector<1x128xf32> to vector<8x128xf32>
    %150 = arith.mulf %148, %149 : vector<8x128xf32>
    %151 = arith.addf %144, %150 : vector<8x128xf32>
    %c3_62 = arith.constant 3 : index
    %c0_63 = arith.constant 0 : index
    %c2_64 = arith.constant 2 : index
    %152 = vector.load %arg2[%c3_62, %c0_63, %c2_64] : memref<8x8x9xf32, #tpu.memory_space<vmem>>, vector<1x8x1xf32>
    %153 = vector.shape_cast %152 : vector<1x8x1xf32> to vector<8x1xf32>
    %154 = vector.extract_strided_slice %138 {offsets = [2, 0], sizes = [1, 128], strides = [1, 1]} : vector<8x128xf32> to vector<1x128xf32>
    %155 = vector.broadcast %153 : vector<8x1xf32> to vector<8x128xf32>
    %156 = vector.broadcast %154 : vector<1x128xf32> to vector<8x128xf32>
    %157 = arith.mulf %155, %156 : vector<8x128xf32>
    %158 = arith.addf %151, %157 : vector<8x128xf32>
    %c3_65 = arith.constant 3 : index
    %c0_66 = arith.constant 0 : index
    %c3_67 = arith.constant 3 : index
    %159 = vector.load %arg2[%c3_65, %c0_66, %c3_67] : memref<8x8x9xf32, #tpu.memory_space<vmem>>, vector<1x8x1xf32>
    %160 = vector.shape_cast %159 : vector<1x8x1xf32> to vector<8x1xf32>
    %161 = vector.extract_strided_slice %138 {offsets = [3, 0], sizes = [1, 128], strides = [1, 1]} : vector<8x128xf32> to vector<1x128xf32>
    %162 = vector.broadcast %160 : vector<8x1xf32> to vector<8x128xf32>
    %163 = vector.broadcast %161 : vector<1x128xf32> to vector<8x128xf32>
    %164 = arith.mulf %162, %163 : vector<8x128xf32>
    %165 = arith.addf %158, %164 : vector<8x128xf32>
    %c3_68 = arith.constant 3 : index
    %c0_69 = arith.constant 0 : index
    %c8_70 = arith.constant 8 : index
    %166 = vector.load %arg2[%c3_68, %c0_69, %c8_70] : memref<8x8x9xf32, #tpu.memory_space<vmem>>, vector<1x8x1xf32>
    %167 = vector.shape_cast %166 : vector<1x8x1xf32> to vector<8x1xf32>
    %168 = vector.broadcast %167 : vector<8x1xf32> to vector<8x128xf32>
    %169 = arith.addf %165, %168 : vector<8x128xf32>
    %170 = math.tanh %169 : vector<8x128xf32>
    %c4_71 = arith.constant 4 : index
    %c0_72 = arith.constant 0 : index
    %c0_73 = arith.constant 0 : index
    %171 = vector.load %arg2[%c4_71, %c0_72, %c0_73] : memref<8x8x9xf32, #tpu.memory_space<vmem>>, vector<1x8x1xf32>
    %172 = vector.shape_cast %171 : vector<1x8x1xf32> to vector<8x1xf32>
    %173 = vector.extract_strided_slice %170 {offsets = [0, 0], sizes = [1, 128], strides = [1, 1]} : vector<8x128xf32> to vector<1x128xf32>
    %174 = vector.broadcast %172 : vector<8x1xf32> to vector<8x128xf32>
    %175 = vector.broadcast %173 : vector<1x128xf32> to vector<8x128xf32>
    %176 = arith.mulf %174, %175 : vector<8x128xf32>
    %c4_74 = arith.constant 4 : index
    %c0_75 = arith.constant 0 : index
    %c1_76 = arith.constant 1 : index
    %177 = vector.load %arg2[%c4_74, %c0_75, %c1_76] : memref<8x8x9xf32, #tpu.memory_space<vmem>>, vector<1x8x1xf32>
    %178 = vector.shape_cast %177 : vector<1x8x1xf32> to vector<8x1xf32>
    %179 = vector.extract_strided_slice %170 {offsets = [1, 0], sizes = [1, 128], strides = [1, 1]} : vector<8x128xf32> to vector<1x128xf32>
    %180 = vector.broadcast %178 : vector<8x1xf32> to vector<8x128xf32>
    %181 = vector.broadcast %179 : vector<1x128xf32> to vector<8x128xf32>
    %182 = arith.mulf %180, %181 : vector<8x128xf32>
    %183 = arith.addf %176, %182 : vector<8x128xf32>
    %c4_77 = arith.constant 4 : index
    %c0_78 = arith.constant 0 : index
    %c2_79 = arith.constant 2 : index
    %184 = vector.load %arg2[%c4_77, %c0_78, %c2_79] : memref<8x8x9xf32, #tpu.memory_space<vmem>>, vector<1x8x1xf32>
    %185 = vector.shape_cast %184 : vector<1x8x1xf32> to vector<8x1xf32>
    %186 = vector.extract_strided_slice %170 {offsets = [2, 0], sizes = [1, 128], strides = [1, 1]} : vector<8x128xf32> to vector<1x128xf32>
    %187 = vector.broadcast %185 : vector<8x1xf32> to vector<8x128xf32>
    %188 = vector.broadcast %186 : vector<1x128xf32> to vector<8x128xf32>
    %189 = arith.mulf %187, %188 : vector<8x128xf32>
    %190 = arith.addf %183, %189 : vector<8x128xf32>
    %c4_80 = arith.constant 4 : index
    %c0_81 = arith.constant 0 : index
    %c8_82 = arith.constant 8 : index
    %191 = vector.load %arg2[%c4_80, %c0_81, %c8_82] : memref<8x8x9xf32, #tpu.memory_space<vmem>>, vector<1x8x1xf32>
    %192 = vector.shape_cast %191 : vector<1x8x1xf32> to vector<8x1xf32>
    %193 = vector.broadcast %192 : vector<8x1xf32> to vector<8x128xf32>
    %194 = arith.addf %190, %193 : vector<8x128xf32>
    %195 = math.tanh %194 : vector<8x128xf32>
    %c5_83 = arith.constant 5 : index
    %c0_84 = arith.constant 0 : index
    %c0_85 = arith.constant 0 : index
    %196 = vector.load %arg2[%c5_83, %c0_84, %c0_85] : memref<8x8x9xf32, #tpu.memory_space<vmem>>, vector<1x8x1xf32>
    %197 = vector.shape_cast %196 : vector<1x8x1xf32> to vector<8x1xf32>
    %198 = vector.extract_strided_slice %195 {offsets = [0, 0], sizes = [1, 128], strides = [1, 1]} : vector<8x128xf32> to vector<1x128xf32>
    %199 = vector.broadcast %197 : vector<8x1xf32> to vector<8x128xf32>
    %200 = vector.broadcast %198 : vector<1x128xf32> to vector<8x128xf32>
    %201 = arith.mulf %199, %200 : vector<8x128xf32>
    %c5_86 = arith.constant 5 : index
    %c0_87 = arith.constant 0 : index
    %c1_88 = arith.constant 1 : index
    %202 = vector.load %arg2[%c5_86, %c0_87, %c1_88] : memref<8x8x9xf32, #tpu.memory_space<vmem>>, vector<1x8x1xf32>
    %203 = vector.shape_cast %202 : vector<1x8x1xf32> to vector<8x1xf32>
    %204 = vector.extract_strided_slice %195 {offsets = [1, 0], sizes = [1, 128], strides = [1, 1]} : vector<8x128xf32> to vector<1x128xf32>
    %205 = vector.broadcast %203 : vector<8x1xf32> to vector<8x128xf32>
    %206 = vector.broadcast %204 : vector<1x128xf32> to vector<8x128xf32>
    %207 = arith.mulf %205, %206 : vector<8x128xf32>
    %208 = arith.addf %201, %207 : vector<8x128xf32>
    %c5_89 = arith.constant 5 : index
    %c0_90 = arith.constant 0 : index
    %c2_91 = arith.constant 2 : index
    %209 = vector.load %arg2[%c5_89, %c0_90, %c2_91] : memref<8x8x9xf32, #tpu.memory_space<vmem>>, vector<1x8x1xf32>
    %210 = vector.shape_cast %209 : vector<1x8x1xf32> to vector<8x1xf32>
    %211 = vector.extract_strided_slice %195 {offsets = [2, 0], sizes = [1, 128], strides = [1, 1]} : vector<8x128xf32> to vector<1x128xf32>
    %212 = vector.broadcast %210 : vector<8x1xf32> to vector<8x128xf32>
    %213 = vector.broadcast %211 : vector<1x128xf32> to vector<8x128xf32>
    %214 = arith.mulf %212, %213 : vector<8x128xf32>
    %215 = arith.addf %208, %214 : vector<8x128xf32>
    %c5_92 = arith.constant 5 : index
    %c0_93 = arith.constant 0 : index
    %c3_94 = arith.constant 3 : index
    %216 = vector.load %arg2[%c5_92, %c0_93, %c3_94] : memref<8x8x9xf32, #tpu.memory_space<vmem>>, vector<1x8x1xf32>
    %217 = vector.shape_cast %216 : vector<1x8x1xf32> to vector<8x1xf32>
    %218 = vector.extract_strided_slice %195 {offsets = [3, 0], sizes = [1, 128], strides = [1, 1]} : vector<8x128xf32> to vector<1x128xf32>
    %219 = vector.broadcast %217 : vector<8x1xf32> to vector<8x128xf32>
    %220 = vector.broadcast %218 : vector<1x128xf32> to vector<8x128xf32>
    %221 = arith.mulf %219, %220 : vector<8x128xf32>
    %222 = arith.addf %215, %221 : vector<8x128xf32>
    %c5_95 = arith.constant 5 : index
    %c0_96 = arith.constant 0 : index
    %c8_97 = arith.constant 8 : index
    %223 = vector.load %arg2[%c5_95, %c0_96, %c8_97] : memref<8x8x9xf32, #tpu.memory_space<vmem>>, vector<1x8x1xf32>
    %224 = vector.shape_cast %223 : vector<1x8x1xf32> to vector<8x1xf32>
    %225 = vector.broadcast %224 : vector<8x1xf32> to vector<8x128xf32>
    %226 = arith.addf %222, %225 : vector<8x128xf32>
    %227 = math.tanh %226 : vector<8x128xf32>
    %c6_98 = arith.constant 6 : index
    %c0_99 = arith.constant 0 : index
    %c0_100 = arith.constant 0 : index
    %228 = vector.load %arg2[%c6_98, %c0_99, %c0_100] : memref<8x8x9xf32, #tpu.memory_space<vmem>>, vector<1x8x1xf32>
    %229 = vector.shape_cast %228 : vector<1x8x1xf32> to vector<8x1xf32>
    %230 = vector.extract_strided_slice %227 {offsets = [0, 0], sizes = [1, 128], strides = [1, 1]} : vector<8x128xf32> to vector<1x128xf32>
    %231 = vector.broadcast %229 : vector<8x1xf32> to vector<8x128xf32>
    %232 = vector.broadcast %230 : vector<1x128xf32> to vector<8x128xf32>
    %233 = arith.mulf %231, %232 : vector<8x128xf32>
    %c6_101 = arith.constant 6 : index
    %c0_102 = arith.constant 0 : index
    %c1_103 = arith.constant 1 : index
    %234 = vector.load %arg2[%c6_101, %c0_102, %c1_103] : memref<8x8x9xf32, #tpu.memory_space<vmem>>, vector<1x8x1xf32>
    %235 = vector.shape_cast %234 : vector<1x8x1xf32> to vector<8x1xf32>
    %236 = vector.extract_strided_slice %227 {offsets = [1, 0], sizes = [1, 128], strides = [1, 1]} : vector<8x128xf32> to vector<1x128xf32>
    %237 = vector.broadcast %235 : vector<8x1xf32> to vector<8x128xf32>
    %238 = vector.broadcast %236 : vector<1x128xf32> to vector<8x128xf32>
    %239 = arith.mulf %237, %238 : vector<8x128xf32>
    %240 = arith.addf %233, %239 : vector<8x128xf32>
    %c6_104 = arith.constant 6 : index
    %c0_105 = arith.constant 0 : index
    %c2_106 = arith.constant 2 : index
    %241 = vector.load %arg2[%c6_104, %c0_105, %c2_106] : memref<8x8x9xf32, #tpu.memory_space<vmem>>, vector<1x8x1xf32>
    %242 = vector.shape_cast %241 : vector<1x8x1xf32> to vector<8x1xf32>
    %243 = vector.extract_strided_slice %227 {offsets = [2, 0], sizes = [1, 128], strides = [1, 1]} : vector<8x128xf32> to vector<1x128xf32>
    %244 = vector.broadcast %242 : vector<8x1xf32> to vector<8x128xf32>
    %245 = vector.broadcast %243 : vector<1x128xf32> to vector<8x128xf32>
    %246 = arith.mulf %244, %245 : vector<8x128xf32>
    %247 = arith.addf %240, %246 : vector<8x128xf32>
    %c6_107 = arith.constant 6 : index
    %c0_108 = arith.constant 0 : index
    %c3_109 = arith.constant 3 : index
    %248 = vector.load %arg2[%c6_107, %c0_108, %c3_109] : memref<8x8x9xf32, #tpu.memory_space<vmem>>, vector<1x8x1xf32>
    %249 = vector.shape_cast %248 : vector<1x8x1xf32> to vector<8x1xf32>
    %250 = vector.extract_strided_slice %227 {offsets = [3, 0], sizes = [1, 128], strides = [1, 1]} : vector<8x128xf32> to vector<1x128xf32>
    %251 = vector.broadcast %249 : vector<8x1xf32> to vector<8x128xf32>
    %252 = vector.broadcast %250 : vector<1x128xf32> to vector<8x128xf32>
    %253 = arith.mulf %251, %252 : vector<8x128xf32>
    %254 = arith.addf %247, %253 : vector<8x128xf32>
    %c6_110 = arith.constant 6 : index
    %c0_111 = arith.constant 0 : index
    %c4_112 = arith.constant 4 : index
    %255 = vector.load %arg2[%c6_110, %c0_111, %c4_112] : memref<8x8x9xf32, #tpu.memory_space<vmem>>, vector<1x8x1xf32>
    %256 = vector.shape_cast %255 : vector<1x8x1xf32> to vector<8x1xf32>
    %257 = vector.extract_strided_slice %227 {offsets = [4, 0], sizes = [1, 128], strides = [1, 1]} : vector<8x128xf32> to vector<1x128xf32>
    %258 = vector.broadcast %256 : vector<8x1xf32> to vector<8x128xf32>
    %259 = vector.broadcast %257 : vector<1x128xf32> to vector<8x128xf32>
    %260 = arith.mulf %258, %259 : vector<8x128xf32>
    %261 = arith.addf %254, %260 : vector<8x128xf32>
    %c6_113 = arith.constant 6 : index
    %c0_114 = arith.constant 0 : index
    %c5_115 = arith.constant 5 : index
    %262 = vector.load %arg2[%c6_113, %c0_114, %c5_115] : memref<8x8x9xf32, #tpu.memory_space<vmem>>, vector<1x8x1xf32>
    %263 = vector.shape_cast %262 : vector<1x8x1xf32> to vector<8x1xf32>
    %264 = vector.extract_strided_slice %227 {offsets = [5, 0], sizes = [1, 128], strides = [1, 1]} : vector<8x128xf32> to vector<1x128xf32>
    %265 = vector.broadcast %263 : vector<8x1xf32> to vector<8x128xf32>
    %266 = vector.broadcast %264 : vector<1x128xf32> to vector<8x128xf32>
    %267 = arith.mulf %265, %266 : vector<8x128xf32>
    %268 = arith.addf %261, %267 : vector<8x128xf32>
    %c6_116 = arith.constant 6 : index
    %c0_117 = arith.constant 0 : index
    %c8_118 = arith.constant 8 : index
    %269 = vector.load %arg2[%c6_116, %c0_117, %c8_118] : memref<8x8x9xf32, #tpu.memory_space<vmem>>, vector<1x8x1xf32>
    %270 = vector.shape_cast %269 : vector<1x8x1xf32> to vector<8x1xf32>
    %271 = vector.broadcast %270 : vector<8x1xf32> to vector<8x128xf32>
    %272 = arith.addf %268, %271 : vector<8x128xf32>
    %273 = math.tanh %272 : vector<8x128xf32>
    %c7_119 = arith.constant 7 : index
    %c0_120 = arith.constant 0 : index
    %c0_121 = arith.constant 0 : index
    %274 = vector.load %arg2[%c7_119, %c0_120, %c0_121] : memref<8x8x9xf32, #tpu.memory_space<vmem>>, vector<1x8x1xf32>
    %275 = vector.shape_cast %274 : vector<1x8x1xf32> to vector<8x1xf32>
    %276 = vector.extract_strided_slice %273 {offsets = [0, 0], sizes = [1, 128], strides = [1, 1]} : vector<8x128xf32> to vector<1x128xf32>
    %277 = vector.broadcast %275 : vector<8x1xf32> to vector<8x128xf32>
    %278 = vector.broadcast %276 : vector<1x128xf32> to vector<8x128xf32>
    %279 = arith.mulf %277, %278 : vector<8x128xf32>
    %c7_122 = arith.constant 7 : index
    %c0_123 = arith.constant 0 : index
    %c1_124 = arith.constant 1 : index
    %280 = vector.load %arg2[%c7_122, %c0_123, %c1_124] : memref<8x8x9xf32, #tpu.memory_space<vmem>>, vector<1x8x1xf32>
    %281 = vector.shape_cast %280 : vector<1x8x1xf32> to vector<8x1xf32>
    %282 = vector.extract_strided_slice %273 {offsets = [1, 0], sizes = [1, 128], strides = [1, 1]} : vector<8x128xf32> to vector<1x128xf32>
    %283 = vector.broadcast %281 : vector<8x1xf32> to vector<8x128xf32>
    %284 = vector.broadcast %282 : vector<1x128xf32> to vector<8x128xf32>
    %285 = arith.mulf %283, %284 : vector<8x128xf32>
    %286 = arith.addf %279, %285 : vector<8x128xf32>
    %c7_125 = arith.constant 7 : index
    %c0_126 = arith.constant 0 : index
    %c2_127 = arith.constant 2 : index
    %287 = vector.load %arg2[%c7_125, %c0_126, %c2_127] : memref<8x8x9xf32, #tpu.memory_space<vmem>>, vector<1x8x1xf32>
    %288 = vector.shape_cast %287 : vector<1x8x1xf32> to vector<8x1xf32>
    %289 = vector.extract_strided_slice %273 {offsets = [2, 0], sizes = [1, 128], strides = [1, 1]} : vector<8x128xf32> to vector<1x128xf32>
    %290 = vector.broadcast %288 : vector<8x1xf32> to vector<8x128xf32>
    %291 = vector.broadcast %289 : vector<1x128xf32> to vector<8x128xf32>
    %292 = arith.mulf %290, %291 : vector<8x128xf32>
    %293 = arith.addf %286, %292 : vector<8x128xf32>
    %c7_128 = arith.constant 7 : index
    %c0_129 = arith.constant 0 : index
    %c3_130 = arith.constant 3 : index
    %294 = vector.load %arg2[%c7_128, %c0_129, %c3_130] : memref<8x8x9xf32, #tpu.memory_space<vmem>>, vector<1x8x1xf32>
    %295 = vector.shape_cast %294 : vector<1x8x1xf32> to vector<8x1xf32>
    %296 = vector.extract_strided_slice %273 {offsets = [3, 0], sizes = [1, 128], strides = [1, 1]} : vector<8x128xf32> to vector<1x128xf32>
    %297 = vector.broadcast %295 : vector<8x1xf32> to vector<8x128xf32>
    %298 = vector.broadcast %296 : vector<1x128xf32> to vector<8x128xf32>
    %299 = arith.mulf %297, %298 : vector<8x128xf32>
    %300 = arith.addf %293, %299 : vector<8x128xf32>
    %c7_131 = arith.constant 7 : index
    %c0_132 = arith.constant 0 : index
    %c4_133 = arith.constant 4 : index
    %301 = vector.load %arg2[%c7_131, %c0_132, %c4_133] : memref<8x8x9xf32, #tpu.memory_space<vmem>>, vector<1x8x1xf32>
    %302 = vector.shape_cast %301 : vector<1x8x1xf32> to vector<8x1xf32>
    %303 = vector.extract_strided_slice %273 {offsets = [4, 0], sizes = [1, 128], strides = [1, 1]} : vector<8x128xf32> to vector<1x128xf32>
    %304 = vector.broadcast %302 : vector<8x1xf32> to vector<8x128xf32>
    %305 = vector.broadcast %303 : vector<1x128xf32> to vector<8x128xf32>
    %306 = arith.mulf %304, %305 : vector<8x128xf32>
    %307 = arith.addf %300, %306 : vector<8x128xf32>
    %c7_134 = arith.constant 7 : index
    %c0_135 = arith.constant 0 : index
    %c5_136 = arith.constant 5 : index
    %308 = vector.load %arg2[%c7_134, %c0_135, %c5_136] : memref<8x8x9xf32, #tpu.memory_space<vmem>>, vector<1x8x1xf32>
    %309 = vector.shape_cast %308 : vector<1x8x1xf32> to vector<8x1xf32>
    %310 = vector.extract_strided_slice %273 {offsets = [5, 0], sizes = [1, 128], strides = [1, 1]} : vector<8x128xf32> to vector<1x128xf32>
    %311 = vector.broadcast %309 : vector<8x1xf32> to vector<8x128xf32>
    %312 = vector.broadcast %310 : vector<1x128xf32> to vector<8x128xf32>
    %313 = arith.mulf %311, %312 : vector<8x128xf32>
    %314 = arith.addf %307, %313 : vector<8x128xf32>
    %c7_137 = arith.constant 7 : index
    %c0_138 = arith.constant 0 : index
    %c6_139 = arith.constant 6 : index
    %315 = vector.load %arg2[%c7_137, %c0_138, %c6_139] : memref<8x8x9xf32, #tpu.memory_space<vmem>>, vector<1x8x1xf32>
    %316 = vector.shape_cast %315 : vector<1x8x1xf32> to vector<8x1xf32>
    %317 = vector.extract_strided_slice %273 {offsets = [6, 0], sizes = [1, 128], strides = [1, 1]} : vector<8x128xf32> to vector<1x128xf32>
    %318 = vector.broadcast %316 : vector<8x1xf32> to vector<8x128xf32>
    %319 = vector.broadcast %317 : vector<1x128xf32> to vector<8x128xf32>
    %320 = arith.mulf %318, %319 : vector<8x128xf32>
    %321 = arith.addf %314, %320 : vector<8x128xf32>
    %c7_140 = arith.constant 7 : index
    %c0_141 = arith.constant 0 : index
    %c7_142 = arith.constant 7 : index
    %322 = vector.load %arg2[%c7_140, %c0_141, %c7_142] : memref<8x8x9xf32, #tpu.memory_space<vmem>>, vector<1x8x1xf32>
    %323 = vector.shape_cast %322 : vector<1x8x1xf32> to vector<8x1xf32>
    %324 = vector.extract_strided_slice %273 {offsets = [7, 0], sizes = [1, 128], strides = [1, 1]} : vector<8x128xf32> to vector<1x128xf32>
    %325 = vector.broadcast %323 : vector<8x1xf32> to vector<8x128xf32>
    %326 = vector.broadcast %324 : vector<1x128xf32> to vector<8x128xf32>
    %327 = arith.mulf %325, %326 : vector<8x128xf32>
    %328 = arith.addf %321, %327 : vector<8x128xf32>
    %c7_143 = arith.constant 7 : index
    %c0_144 = arith.constant 0 : index
    %c8_145 = arith.constant 8 : index
    %329 = vector.load %arg2[%c7_143, %c0_144, %c8_145] : memref<8x8x9xf32, #tpu.memory_space<vmem>>, vector<1x8x1xf32>
    %330 = vector.shape_cast %329 : vector<1x8x1xf32> to vector<8x1xf32>
    %331 = vector.broadcast %330 : vector<8x1xf32> to vector<8x128xf32>
    %332 = arith.addf %328, %331 : vector<8x128xf32>
    %333 = vector.extract_strided_slice %332 {offsets = [0, 0], sizes = [4, 128], strides = [1, 1]} : vector<8x128xf32> to vector<4x128xf32>
    %c0_146 = arith.constant 0 : index
    %c0_147 = arith.constant 0 : index
    %334 = vector.load %arg3[%c0_146, %c0_147] : memref<4x128xf32, #tpu.memory_space<vmem>>, vector<4x128xf32>
    tpu.vector_store %arg3[%c0_146, %c0_147], %333 {strides = array<i32>} : memref<4x128xf32, #tpu.memory_space<vmem>>, vector<4x128xf32>,
    return
  }
  func.func @transform_0(%arg0: i32) -> (i32, i32) {
    %c0_i32 = arith.constant 0 : i32
    %c0_i32_0 = arith.constant 0 : i32
    return %c0_i32, %arg0 : i32, i32
  }
  func.func @transform_1(%arg0: i32) -> (i32, i32, i32) {
    %c0_i32 = arith.constant 0 : i32
    %c0_i32_0 = arith.constant 0 : i32
    %c0_i32_1 = arith.constant 0 : i32
    %c0_i32_2 = arith.constant 0 : i32
    return %c0_i32, %c0_i32_0, %c0_i32_1 : i32, i32, i32
  }
  func.func @transform_2(%arg0: i32) -> (i32, i32) {
    %c0_i32 = arith.constant 0 : i32
    %c0_i32_0 = arith.constant 0 : i32
    return %c0_i32, %arg0 : i32, i32
  }
}

</mosaic_0001>

<bundles_post_ra>
// kernel: tpu_custom_call.1
= control target key start
LH: loop header
LB: loop body
LE: loop exit
PB: predicated region body
PF: predicated region fallthrough
CT: control target
= control target key end

     0   :  { %7 = vsyncpa [#allocation3], 0  ;;  %s1402_s0 = inlined_call_operand.hbm [shape: f32[4,256], index: 0, kind: input, shape index: {}]   ;;  %s1403_s1 = inlined_call_operand.hbm [shape: f32[8,8,9], index: 1, kind: input, shape index: {}]   ;;  %s1404_s2 = inlined_call_operand.hbm [shape: f32[4,256], index: 2, kind: output, shape index: {}]  }
   0x1   :  { %9 = vsyncpa [#allocation3 + $0x1], 0 }
   0x2   :  { %10 = vsyncpa [#allocation6], 0 }
   0x3   :  { %11 = vsyncpa [#allocation4], 0 }
   0x4   :  { %13 = vsyncpa [#allocation4 + $0x1], 0  ;;  %s1068_s9 = smov 0   ;;  %s1070_s10 = smov 0  }
   0x5   :  { %s1072_s11 = smov 0   ;;  %s1074_s12 = smov 0  }
   0x6 LB: > { %s1089_s13 = sadd.s32 4294967295, %s1037_s12   ;;  %s762_s14 = sadd.s32 4294967294, %s1037_s12   ;;  %s1037_s12 = sphi %s1074_s12, %s1424_s12   ;;  %s1033_s11 = sphi %s1072_s11, %s1423_s11   ;;  %s1029_s10 = sphi %s1070_s10, %s1422_s10   ;;  %s1025_s9 = sphi %s1068_s9, %s1421_s9  }
   0x7   : > { %p39_p0 = scmp.ne.s32.totalorder %s1029_s10, %s1025_s9  ;;  %p1405_p1 = scmp.eq.s32.totalorder %s1089_s13, 0 }
   0x8   : > { %p90_p3 = scmp.eq.s32.totalorder %s762_s14, 1  ;;  %p763_p5 = scmp.ge.s32.totalorder %s1037_s12, 1 }
   0x9   : > { %p1098_p4 = por %p1405_p1, %p39_p0  ;;  %p97_p7 = scmp.lt.s32.totalorder %s1037_s12, 3 }
   0xa   : > { %p1103_p6 = por %p90_p3, %p39_p0  ;;  %s1039_s18 = smov [#allocation5]  }
   0xb   : > { %s1408_s15 = scalar_select %p1098_p4, 1, 0 }
   0xc   : > { %s1409_s16 = scalar_select %p1103_p6, 1, 0 }
   0xd   : > { %p1108_p8 = pnand %p763_p5, %p97_p7  ;;  %s109_s19 = sshll.u32 %s1039_s18, 4  ;;  %s1112_s19 = int_to_ptr.vmem [resolvable:$true] %s109_s19 }
   0xe   : > { %s1124_s21 = sadd.s32 1, %s1037_s12   ;;  %s26_s22 = sadd.s32 1, %s1033_s11 }
   0xf   : > { %s1410_s17 = scalar_select %p1108_p8, 1, 0 }
  0x10   : > { %p784_p9 = pneg %p1108_p8  ;;  %s23_s23 = ssub.s32 %s1037_s12, %s1124_s21 }
  0x11   : > { %s909_s26 = scalar_lea.hbm %s1403_s1, 1024 }
  0x12   : > { %p1119_p11 = pnand %p784_p9, %p1405_p1  ;;  %p910_p12 = scmp.ne.s32.totalorder %s1403_s1, %s909_s26 }
  0x13   : > { %p916_p5 = scmp.lt.u32.totalorder %s909_s26, %s1403_s1 }
  0x14   : > { %p911_p13 = pneg %p1119_p11 }
  0x16   : > { %p912_p0 = pnand %p911_p13, %p910_p12 }
  0x18   : > { %p913_p3 = pneg %p912_p0 }
  0x1a   : > { %p918_p7 = pnand %p916_p5, %p913_p3 }
  0x1c   : > { %921 = shalt.err (!%p918_p7)
}
  0x1d   : > { %s922_s3 = scalar_lea.vmem %s1112_s19, 1024  ;;  %p930_p2 = scmp.lt.s32.totalorder %s1112_s19, %s1112_s19 }
  0x1e   : > { %p923_p9 = scmp.ne.s32.totalorder %s1112_s19, %s922_s3  ;;  %p931_p6 = scmp.lt.s32.totalorder %s922_s3, %s922_s3 }
  0x20   : > { %p925_p10 = pnand %p923_p9, %p911_p13  ;;  %p932_p4 = por %p931_p6, %p930_p2 }
  0x22   : > { %p926_p1 = pneg %p925_p10 }
  0x24   : > { %p933_p8 = pnand %p932_p4, %p926_p1 }
  0x26   : > { %936 = shalt.err (!%p933_p8)
}
  0x27   : > { %s1040_s4 = smov 128   ;;  %s1041_s5 = smov 8  }
  0x28   : > { %787 = dma.hbm_to_vmem [thread:$0]  (!%p1119_p11), %s1403_s1, 1024, %s1112_s19, [#allocation6], %s1040_s4, %s1040_s4, %s1041_s5  }
  0x29   : > { %p24_p2 = scmp.eq.s32.totalorder %s23_s23, 0  ;;  %p33_p1 = scmp.ne.s32.totalorder %s1033_s11, %s1029_s10 }
  0x2a   : > { %p34_p4 = scmp.eq.s32.totalorder %s1037_s12, 0  ;;  %p797_p6 = scmp.lt.s32.totalorder %s1037_s12, 2 }
  0x2b   : > { %s1155_s8 = scalar_select %p24_p2, %s1033_s11, %s26_s22  }
  0x2c   : > { %p35_p8 = por %p34_p4, %p33_p1  ;;  %p1412_p10 = scmp.eq.s32.totalorder %s1089_s13, 1 }
  0x2d   : > { %s123_s18 = sand.u32 1, %s1033_s11   ;;  %s767_s24 = sshll.u32 %s1037_s12, 6 }
  0x2e   : > { %p1159_p12 = por %p1412_p10, %p33_p1  ;;  %s766_s25 = sshll.u32 %s123_s18, 2 }
  0x2f   : > { %s1168_s27 = scalar_lea.hbm %s1402_s0, %s767_s24  ;;  %s127_s19 = scalar_lea.vmem [#allocation2], %s766_s25 }
  0x30   : > { %s134_s22 = sshll.u32 %s127_s19, 4  ;;  %p1170_p11 = pnand %p797_p6, %p35_p8  ;;  %s1174_s22 = int_to_ptr.vmem [resolvable:$true] %s134_s22 }
  0x31   : > { %s124_s28 = scalar_lea.sflag [#allocation3], %s123_s18  ;;  %s937_s29 = scalar_lea.hbm %s1168_s27, 64 }
  0x32   : > { %p938_p13 = scmp.ne.s32.totalorder %s1168_s27, %s937_s29  ;;  %p939_p0 = pneg %p1170_p11 }
  0x33   : > { %s942_s4 = scalar_lea.hbm %s1402_s0, 128  ;;  %p943_p7 = scmp.lt.u32.totalorder %s1168_s27, %s1402_s0 }
  0x34   : > { %p940_p3 = pnand %p939_p0, %p938_p13  ;;  %p944_p9 = scmp.lt.u32.totalorder %s942_s4, %s937_s29 }
  0x35   : > { %p946_p1 = scmp.lt.u32.totalorder %s937_s29, %s1168_s27 }
  0x36   : > { %p941_p5 = pneg %p940_p3  ;;  %p945_p2 = por %p944_p9, %p943_p7 }
  0x38   : > { %p947_p4 = por %p946_p1, %p945_p2 }
  0x3a   : > { %p948_p6 = pnand %p947_p4, %p941_p5 }
  0x3c   : > { %951 = shalt.err (!%p948_p6)
}
  0x3d   : > { %s952_s7 = scalar_lea.vmem %s1174_s22, 64  ;;  %s1042_s18 = smov [#allocation2]  }
  0x3e   : > { %p953_p8 = scmp.ne.s32.totalorder %s1174_s22, %s952_s7  ;;  %s957_s24 = sshll.u32 %s1042_s18, 4  ;;  %s958_s24 = int_to_ptr.vmem [resolvable:$false] %s957_s24 }
  0x3f   : > { %s959_s25 = scalar_lea.vmem %s958_s24, 128  ;;  %p960_p3 = scmp.lt.s32.totalorder %s1174_s22, %s958_s24 }
  0x40   : > { %p955_p10 = pnand %p953_p8, %p939_p0  ;;  %p961_p7 = scmp.lt.s32.totalorder %s959_s25, %s952_s7 }
  0x42   : > { %p956_p13 = pneg %p955_p10  ;;  %p962_p9 = por %p961_p7, %p960_p3 }
  0x44   : > { %p963_p2 = pnand %p962_p9, %p956_p13 }
  0x46   : > { %966 = shalt.err (!%p963_p2)
}
  0x47   : > { %791 = dma.hbm_to_vmem [thread:$0]  (!%p1170_p11), %s1168_s27, 64, %s1174_s22, %s124_s28  }
  0x48   : > { %p1415_p5 = scmp.ne.s32.totalorder %s1410_s17, 0 }
  0x49   : > { %s1204_s20 = sand.u32 (!%p1415_p5), 1, %s1029_s10   ;;  %p1416_p0 = scmp.ne.s32.totalorder (!%p1415_p5), %s1408_s15, 0 }
  0x4a   : > { %143 = sbr.rel (%p1415_p5) target bundleno = 427 (0x1ab), region = 28  ;;  %s769_s26 = sshll.u32 (!%p1415_p5), %s1204_s20, 2 }
  0x4b   : > { %s146_s19 = scalar_lea.sflag (!%p1415_p5), [#allocation3], %s1204_s20  ;;  %s1210_s29 = scalar_lea.vmem (!%p1415_p5), [#allocation2], %s769_s26 }
  0x51   : > { %1012 = dma.done.wait (%p1416_p0), %s146_s19, 64  }
  0x52   : > { %1014 = vsyncadd (%p1416_p0), %s146_s19, 4294967232  ;;  %p1417_p11 = scmp.eq.s32.totalorder %s1089_s13, 0 }
  0x54   : > { %1016 = dma.done.wait (%p1417_p11), [#allocation6], 1024   ;;  %p1418_p1 = pmov %p1417_p11 }
  0x55   : > { %v1043_v0 = vmov 2   ;;  %v1044_v1 = vmov 0   ;;  %v175_v2 = vld [vmem:[#allocation5] sm:$0xff]  ;;  %v1045_v3 = vmov 3   ;;  %v1046_v4 = vmov 1   ;;  %v223_v6 = vld [vmem:[#allocation5 + $0x8] sm:$0xff] }
  0x56   : > { %1018 = vsyncadd (%p1418_p1), [#allocation6], 4294966272  ;;  %846 = vset.pattern.permute.xlu1 %v1043_v0  ;;  %844 = vset.pattern.permute.xlu0 %v1044_v1  ;;  %v1047_v5 = vmov 8   ;;  %v1048_v7 = vmov 6   ;;  %v1049_v8 = vmov 4   ;;  %v311_v9 = vld [vmem:[#allocation5 + $0x10] sm:$0xff]  ;;  %v181_v17 = vlaneseq }
  0x57   : > { %197 = vperm.xlu1 %846, %v175_v2   ;;  %178 = vperm.xlu0 %844, %v175_v2   ;;  %v1050_v10 = vmov 5   ;;  %v1051_v11 = vmov 7   ;;  %v379_v12 = vld [vmem:[#allocation5 + $0x18] sm:$0xff]  ;;  %v427_v13 = vld [vmem:[#allocation5 + $0x20] sm:$0xff]  ;;  %v465_v14 = vld [vmem:[#allocation5 + $0x28] sm:$0xff]  ;;  %s773_s15 = sshll.u32 %s1089_s13, 6 }
  0x58   : > { %v513_v15 = vld [vmem:[#allocation5 + $0x30] sm:$0xff]  ;;  %v1251_v16 = vld [vmem:[#allocation5 + $0x38] sm:$0xff]  ;;  %v1268_v18 = vshrl.u32 %v181_v17, 7  ;;  %s173_s17 = scalar_lea.vmem [#allocation7], %s769_s26  ;;  %s1358_s28 = scalar_lea.hbm %s1404_s2, %s773_s15 }
  0x59   : > { %v174_v21 = vld [vmem:[%s1210_s29] sm:$0xf]  ;;  %s682_s27 = sshll.u32 %s173_s17, 4  ;;  %s669_s30 = scalar_lea.sflag [#allocation4], %s1204_s20  ;;  %s1360_s27 = int_to_ptr.vmem [resolvable:$true] %s682_s27 }
  0x5a   : > { %v1272_v19 = vsub.s32 0, %v1268_v18  ;;  %v1275_v20 = vsub.s32 1, %v1268_v18  ;;  %v1279_v23 = vsub.s32 2, %v1268_v18  ;;  %v1282_v25 = vsub.s32 3, %v1268_v18  ;;  %s967_s3 = scalar_lea.vmem %s1360_s27, 64  ;;  %s1052_s13 = smov [#allocation7]  }
  0x5b   : > { %847 = vset.pattern.permute.xlu1 %v1045_v3  ;;  %845 = vset.pattern.permute.xlu0 %v1046_v4  ;;  %v1301_v49 = vsub.s32 4, %v1268_v18  ;;  %v290_v54 = vsub.s32 6, %v1268_v18  ;;  %v1309_v58 = vsub.s32 5, %v1268_v18  ;;  %v300_v62 = vsub.s32 7, %v1268_v18  ;;  %p968_p4 = scmp.ne.s32.totalorder %s1360_s27, %s967_s3  ;;  %s971_s4 = sshll.u32 %s1052_s13, 4  ;;  %s972_s4 = int_to_ptr.vmem [resolvable:$false] %s971_s4 }
  0x5c   : > { %207 = vperm.xlu1 %847, %v175_v2   ;;  %187 = vperm.xlu0 %845, %v175_v2   ;;  %v184_v26 = vrot.slane %v174_v21, %v1272_v19  ;;  %v193_v27 = vrot.slane %v174_v21, %v1275_v20  ;;  %v203_v28 = vrot.slane %v174_v21, %v1279_v23  ;;  %s973_s5 = scalar_lea.vmem %s972_s4, 128  ;;  %p974_p10 = scmp.lt.s32.totalorder %s1360_s27, %s972_s4 }
  0x5d   : > { %v213_v29 = vrot.slane %v174_v21, %v1282_v25  ;;  %p969_p6 = pnand %p968_p4, %p1159_p12  ;;  %p975_p13 = scmp.lt.s32.totalorder %s973_s5, %s967_s3 }
  0x5f   : > { %p970_p8 = pneg %p969_p6  ;;  %p976_p3 = por %p975_p13, %p974_p10 }
  0x60   : > { %848 = vset.pattern.permute.xlu1 %v1047_v5  ;;  %849 = vset.pattern.permute.xlu0 %v1044_v1 }
  0x61   : > { %217 = vperm.xlu1 %848, %v175_v2   ;;  %226 = vperm.xlu0 %849, %v223_v6   ;;  %p977_p7 = pnand %p976_p3, %p970_p8 }
  0x65   : > { %850 = vset.pattern.permute.xlu1 %v1046_v4  ;;  %852 = vset.pattern.permute.xlu0 %v1045_v3 }
  0x66   : > { %235 = vperm.xlu1 %850, %v223_v6   ;;  %255 = vperm.xlu0 %852, %v223_v6  }
  0x6a   : > { %851 = vset.pattern.permute.xlu1 %v1043_v0  ;;  %855 = vset.pattern.permute.xlu0 %v1048_v7 }
  0x6b   : > { %245 = vperm.xlu1 %851, %v223_v6   ;;  %285 = vperm.xlu0 %855, %v223_v6  }
  0x6f   : > { %853 = vset.pattern.permute.xlu1 %v1049_v8  ;;  %858 = vset.pattern.permute.xlu0 %v1044_v1 }
  0x70   : > { %265 = vperm.xlu1 %853, %v223_v6   ;;  %314 = vperm.xlu0 %858, %v311_v9  }
  0x74   : > { %854 = vset.pattern.permute.xlu1 %v1050_v10  ;;  %861 = vset.pattern.permute.xlu0 %v1045_v3 }
  0x75   : > { %275 = vperm.xlu1 %854, %v223_v6   ;;  %343 = vperm.xlu0 %861, %v311_v9  }
  0x79   : > { %856 = vset.pattern.permute.xlu1 %v1051_v11  ;;  %864 = vset.pattern.permute.xlu0 %v1047_v5 }
  0x7a   : > { %295 = vperm.xlu1 %856, %v223_v6   ;;  %373 = vperm.xlu0 %864, %v311_v9  }
  0x7e   : > { %857 = vset.pattern.permute.xlu1 %v1047_v5  ;;  %867 = vset.pattern.permute.xlu0 %v1043_v0 }
  0x7f   : > { %305 = vperm.xlu1 %857, %v223_v6   ;;  %401 = vperm.xlu0 %867, %v379_v12  }
  0x83   : > { %859 = vset.pattern.permute.xlu1 %v1046_v4  ;;  %870 = vset.pattern.permute.xlu0 %v1044_v1 }
  0x84   : > { %323 = vperm.xlu1 %859, %v311_v9   ;;  %430 = vperm.xlu0 %870, %v427_v13  }
  0x88   : > { %860 = vset.pattern.permute.xlu1 %v1043_v0  ;;  %873 = vset.pattern.permute.xlu0 %v1047_v5 }
  0x89   : > { %333 = vperm.xlu1 %860, %v311_v9   ;;  %459 = vperm.xlu0 %873, %v427_v13  }
  0x8d   : > { %862 = vset.pattern.permute.xlu1 %v1049_v8  ;;  %876 = vset.pattern.permute.xlu0 %v1043_v0 }
  0x8e   : > { %353 = vperm.xlu1 %862, %v311_v9   ;;  %487 = vperm.xlu0 %876, %v465_v14  }
  0x92   : > { %863 = vset.pattern.permute.xlu1 %v1050_v10  ;;  %879 = vset.pattern.permute.xlu0 %v1044_v1 }
  0x93   : > { %363 = vperm.xlu1 %863, %v311_v9   ;;  %516 = vperm.xlu0 %879, %v513_v15  }
  0x97   : > { %865 = vset.pattern.permute.xlu1 %v1044_v1  ;;  %882 = vset.pattern.permute.xlu0 %v1045_v3 }
  0x98   : > { %382 = vperm.xlu1 %865, %v379_v12   ;;  %545 = vperm.xlu0 %882, %v513_v15  }
  0x9c   : > { %866 = vset.pattern.permute.xlu1 %v1046_v4  ;;  %885 = vset.pattern.permute.xlu0 %v1047_v5 }
  0x9d   : > { %391 = vperm.xlu1 %866, %v379_v12   ;;  %575 = vperm.xlu0 %885, %v513_v15  }
  0xa1   : > { %868 = vset.pattern.permute.xlu1 %v1045_v3  ;;  %888 = vset.pattern.permute.xlu0 %v1043_v0 }
  0xa2   : > { %411 = vperm.xlu1 %868, %v379_v12   ;;  %603 = vperm.xlu0 %888, %v1251_v16  }
  0xa6   : > { %869 = vset.pattern.permute.xlu1 %v1047_v5  ;;  %891 = vset.pattern.permute.xlu0 %v1050_v10 }
  0xa7   : > { %421 = vperm.xlu1 %869, %v379_v12   ;;  %633 = vperm.xlu0 %891, %v1251_v16  }
  0xab   : > { %871 = vset.pattern.permute.xlu1 %v1046_v4  ;;  %894 = vset.pattern.permute.xlu0 %v1047_v5 }
  0xac   : > { %439 = vperm.xlu1 %871, %v427_v13   ;;  %663 = vperm.xlu0 %894, %v1251_v16  }
  0xb0   : > { %872 = vset.pattern.permute.xlu1 %v1043_v0 }
  0xb1   : > { %449 = vperm.xlu1 %872, %v427_v13  }
  0xb5   : > { %874 = vset.pattern.permute.xlu1 %v1044_v1 }
  0xb6   : > { %468 = vperm.xlu1 %874, %v465_v14  }
  0xba   : > { %875 = vset.pattern.permute.xlu1 %v1046_v4 }
  0xbb   : > { %477 = vperm.xlu1 %875, %v465_v14  }
  0xbf   : > { %877 = vset.pattern.permute.xlu1 %v1045_v3 }
  0xc0   : > { %497 = vperm.xlu1 %877, %v465_v14  }
  0xc4   : > { %878 = vset.pattern.permute.xlu1 %v1047_v5 }
  0xc5   : > { %507 = vperm.xlu1 %878, %v465_v14  }
  0xc9   : > { %880 = vset.pattern.permute.xlu1 %v1046_v4 }
  0xca   : > { %525 = vperm.xlu1 %880, %v513_v15  }
  0xce   : > { %881 = vset.pattern.permute.xlu1 %v1043_v0 }
  0xcf   : > { %535 = vperm.xlu1 %881, %v513_v15  }
  0xd3   : > { %883 = vset.pattern.permute.xlu1 %v1049_v8 }
  0xd4   : > { %555 = vperm.xlu1 %883, %v513_v15  }
  0xd6   : > { %v179_v22 = vpop.permute.xlu0 %178  ;;  %v198_v24 = vpop.permute.xlu1 %197 }
  0xd7   : > { %v185_v32 = vmul.f32 %v184_v26, %v179_v22  ;;  %v204_v34 = vmul.f32 %v203_v28, %v198_v24 }
  0xd8   : > { %884 = vset.pattern.permute.xlu1 %v1050_v10 }
  0xd9   : > { %565 = vperm.xlu1 %884, %v513_v15  }
  0xdb   : > { %v188_v30 = vpop.permute.xlu0 %187  ;;  %v208_v31 = vpop.permute.xlu1 %207 }
  0xdc   : > { %v194_v33 = vmul.f32 %v193_v27, %v188_v30  ;;  %v214_v36 = vmul.f32 %v213_v29, %v208_v31 }
  0xdd   : > { %886 = vset.pattern.permute.xlu1 %v1044_v1 }
  0xde   : > { %v195_v35 = vadd.f32 %v194_v33, %v185_v32  ;;  %584 = vperm.xlu1 %886, %v1251_v16  }
  0xe0   : > { %v218_v37 = vpop.permute.xlu1 %217  ;;  %v205_v38 = vadd.f32 %v204_v34, %v195_v35  ;;  %v227_v43 = vpop.permute.xlu0 %226 }
  0xe2   : > { %v215_v39 = vadd.f32 %v214_v36, %v205_v38  ;;  %887 = vset.pattern.permute.xlu1 %v1046_v4 }
  0xe3   : > { %593 = vperm.xlu1 %887, %v1251_v16  }
  0xe4   : > { %v220_v40 = vadd.f32 %v218_v37, %v215_v39 }
  0xe5   : > { %v236_v41 = vpop.permute.xlu1 %235  ;;  %v256_v53 = vpop.permute.xlu0 %255 }
  0xe6   : > { %895 = vtanh.f32 %v220_v40 }
  0xe7   : > { %889 = vset.pattern.permute.xlu1 %v1045_v3 }
  0xe8   : > { %613 = vperm.xlu1 %889, %v1251_v16  }
  0xea   : > { %v246_v42 = vpop.permute.xlu1 %245  ;;  %v286_v3 = vpop.permute.xlu0 %285 }
  0xec   : > { %890 = vset.pattern.permute.xlu1 %v1049_v8 }
  0xed   : > { %623 = vperm.xlu1 %890, %v1251_v16  }
  0xef   : > { %v266_v44 = vpop.permute.xlu1 %265  ;;  %v315_v17 = vpop.permute.xlu0 %314 }
  0xf0   : > { %v896_v45 = vpop.eup %895 }
  0xf1   : > { %v241_v46 = vrot.slane %v896_v45, %v1275_v20  ;;  %v232_v47 = vrot.slane %v896_v45, %v1272_v19  ;;  %v251_v48 = vrot.slane %v896_v45, %v1279_v23  ;;  %892 = vset.pattern.permute.xlu1 %v1048_v7  ;;  %v261_v52 = vrot.slane %v896_v45, %v1282_v25 }
  0xf2   : > { %643 = vperm.xlu1 %892, %v1251_v16   ;;  %v271_v57 = vrot.slane %v896_v45, %v1301_v49  ;;  %v291_v1 = vrot.slane %v896_v45, %v290_v54  ;;  %v281_v2 = vrot.slane %v896_v45, %v1309_v58  ;;  %v301_v9 = vrot.slane %v896_v45, %v300_v62 }
  0xf3   : > { %v242_v50 = vmul.f32 %v241_v46, %v236_v41  ;;  %v233_v51 = vmul.f32 %v232_v47, %v227_v43  ;;  %v252_v56 = vmul.f32 %v251_v48, %v246_v42  ;;  %v262_v61 = vmul.f32 %v261_v52, %v256_v53 }
  0xf4   : > { %v276_v59 = vpop.permute.xlu1 %275  ;;  %v272_v0 = vmul.f32 %v271_v57, %v266_v44  ;;  %v292_v7 = vmul.f32 %v291_v1, %v286_v3  ;;  %v344_v31 = vpop.permute.xlu0 %343 }
  0xf5   : > { %v243_v55 = vadd.f32 %v242_v50, %v233_v51  ;;  %v282_v5 = vmul.f32 %v281_v2, %v276_v59 }
  0xf6   : > { %893 = vset.pattern.permute.xlu1 %v1051_v11 }
  0xf7   : > { %v253_v60 = vadd.f32 %v252_v56, %v243_v55  ;;  %653 = vperm.xlu1 %893, %v1251_v16  }
  0xf9   : > { %v263_v63 = vadd.f32 %v262_v61, %v253_v60  ;;  %v296_v6 = vpop.permute.xlu1 %295  ;;  %v374_v43 = vpop.permute.xlu0 %373 }
  0xfa   : > { %v302_v10 = vmul.f32 %v301_v9, %v296_v6 }
  0xfb   : > { %v273_v4 = vadd.f32 %v272_v0, %v263_v63 }
  0xfd   : > { %v283_v8 = vadd.f32 %v282_v5, %v273_v4 }
  0xfe   : > { %v306_v11 = vpop.permute.xlu1 %305  ;;  %v402_v53 = vpop.permute.xlu0 %401 }
  0xff   : > { %v293_v12 = vadd.f32 %v292_v7, %v283_v8 }
 0x101   : > { %v303_v13 = vadd.f32 %v302_v10, %v293_v12 }
 0x103   : > { %v308_v14 = vadd.f32 %v306_v11, %v303_v13  ;;  %v324_v15 = vpop.permute.xlu1 %323  ;;  %v431_v6 = vpop.permute.xlu0 %430 }
 0x105   : > { %897 = vtanh.f32 %v308_v14 }
 0x108   : > { %v334_v16 = vpop.permute.xlu1 %333 }
 0x10d   : > { %v354_v27 = vpop.permute.xlu1 %353 }
 0x10f   : > { %v898_v21 = vpop.eup %897 }
 0x110   : > { %v329_v22 = vrot.slane %v898_v21, %v1275_v20  ;;  %v339_v24 = vrot.slane %v898_v21, %v1279_v23  ;;  %v320_v26 = vrot.slane %v898_v21, %v1272_v19  ;;  %v349_v30 = vrot.slane %v898_v21, %v1282_v25 }
 0x111   : > { %v359_v34 = vrot.slane %v898_v21, %v1301_v49  ;;  %v369_v37 = vrot.slane %v898_v21, %v1309_v58 }
 0x112   : > { %v330_v28 = vmul.f32 %v329_v22, %v324_v15  ;;  %v321_v29 = vmul.f32 %v320_v26, %v315_v17  ;;  %v340_v32 = vmul.f32 %v339_v24, %v334_v16  ;;  %v350_v36 = vmul.f32 %v349_v30, %v344_v31  ;;  %v364_v38 = vpop.permute.xlu1 %363  ;;  %v460_v15 = vpop.permute.xlu0 %459 }
 0x113   : > { %v360_v39 = vmul.f32 %v359_v34, %v354_v27  ;;  %v370_v41 = vmul.f32 %v369_v37, %v364_v38 }
 0x114   : > { %v331_v33 = vadd.f32 %v330_v28, %v321_v29 }
 0x116   : > { %v341_v35 = vadd.f32 %v340_v32, %v331_v33  ;;  %v488_v30 = vpop.permute.xlu0 %487 }
 0x117   : > { %v383_v46 = vpop.permute.xlu1 %382 }
 0x118   : > { %v351_v40 = vadd.f32 %v350_v36, %v341_v35 }
 0x11a   : > { %v361_v42 = vadd.f32 %v360_v39, %v351_v40 }
 0x11c   : > { %v371_v44 = vadd.f32 %v370_v41, %v361_v42  ;;  %v392_v47 = vpop.permute.xlu1 %391 }
 0x11e   : > { %v376_v45 = vadd.f32 %v374_v43, %v371_v44  ;;  %v517_v43 = vpop.permute.xlu0 %516 }
 0x120   : > { %899 = vtanh.f32 %v376_v45 }
 0x121   : > { %v412_v59 = vpop.permute.xlu1 %411 }
 0x126   : > { %v422_v1 = vpop.permute.xlu1 %421 }
 0x12a   : > { %v900_v48 = vpop.eup %899 }
 0x12b   : > { %v388_v50 = vrot.slane %v900_v48, %v1272_v19  ;;  %v397_v51 = vrot.slane %v900_v48, %v1275_v20  ;;  %v407_v52 = vrot.slane %v900_v48, %v1279_v23  ;;  %v417_v57 = vrot.slane %v900_v48, %v1282_v25  ;;  %v440_v4 = vpop.permute.xlu1 %439 }
 0x12d   : > { %v389_v55 = vmul.f32 %v388_v50, %v383_v46  ;;  %v398_v56 = vmul.f32 %v397_v51, %v392_v47  ;;  %v408_v61 = vmul.f32 %v407_v52, %v402_v53  ;;  %v418_v63 = vmul.f32 %v417_v57, %v412_v59  ;;  %v546_v53 = vpop.permute.xlu0 %545 }
 0x12f   : > { %v399_v60 = vadd.f32 %v398_v56, %v389_v55 }
 0x130   : > { %v450_v10 = vpop.permute.xlu1 %449 }
 0x131   : > { %v409_v0 = vadd.f32 %v408_v61, %v399_v60 }
 0x133   : > { %v419_v2 = vadd.f32 %v418_v63, %v409_v0 }
 0x135   : > { %v424_v3 = vadd.f32 %v422_v1, %v419_v2  ;;  %v469_v21 = vpop.permute.xlu1 %468 }
 0x137   : > { %901 = vtanh.f32 %v424_v3 }
 0x13a   : > { %v478_v22 = vpop.permute.xlu1 %477 }
 0x13f   : > { %v498_v28 = vpop.permute.xlu1 %497 }
 0x141   : > { %v902_v5 = vpop.eup %901 }
 0x142   : > { %v445_v7 = vrot.slane %v902_v5, %v1275_v20  ;;  %v455_v8 = vrot.slane %v902_v5, %v1279_v23  ;;  %v436_v9 = vrot.slane %v902_v5, %v1272_v19  ;;  %v576_v5 = vpop.permute.xlu0 %575 }
 0x144   : > { %v446_v11 = vmul.f32 %v445_v7, %v440_v4  ;;  %v437_v12 = vmul.f32 %v436_v9, %v431_v6  ;;  %v456_v13 = vmul.f32 %v455_v8, %v450_v10  ;;  %v508_v36 = vpop.permute.xlu1 %507 }
 0x146   : > { %v447_v14 = vadd.f32 %v446_v11, %v437_v12 }
 0x148   : > { %v457_v16 = vadd.f32 %v456_v13, %v447_v14 }
 0x149   : > { %v526_v41 = vpop.permute.xlu1 %525 }
 0x14a   : > { %v462_v17 = vadd.f32 %v460_v15, %v457_v16  ;;  %v604_v15 = vpop.permute.xlu0 %603 }
 0x14c   : > { %903 = vtanh.f32 %v462_v17 }
 0x14e   : > { %v536_v42 = vpop.permute.xlu1 %535 }
 0x153   : > { %v556_v45 = vpop.permute.xlu1 %555 }
 0x156   : > { %v904_v24 = vpop.eup %903 }
 0x157   : > { %v474_v26 = vrot.slane %v904_v24, %v1272_v19  ;;  %v483_v27 = vrot.slane %v904_v24, %v1275_v20  ;;  %v493_v29 = vrot.slane %v904_v24, %v1279_v23  ;;  %v503_v33 = vrot.slane %v904_v24, %v1282_v25 }
 0x158   : > { %v566_v59 = vpop.permute.xlu1 %565 }
 0x159   : > { %v475_v31 = vmul.f32 %v474_v26, %v469_v21  ;;  %v484_v32 = vmul.f32 %v483_v27, %v478_v22  ;;  %v494_v35 = vmul.f32 %v493_v29, %v488_v30  ;;  %v504_v37 = vmul.f32 %v503_v33, %v498_v28  ;;  %v634_v30 = vpop.permute.xlu0 %633 }
 0x15b   : > { %v485_v34 = vadd.f32 %v484_v32, %v475_v31 }
 0x15d   : > { %v495_v38 = vadd.f32 %v494_v35, %v485_v34  ;;  %v585_v2 = vpop.permute.xlu1 %584 }
 0x15f   : > { %v505_v39 = vadd.f32 %v504_v37, %v495_v38  ;;  %v664_v38 = vpop.permute.xlu0 %663 }
 0x161   : > { %v510_v40 = vadd.f32 %v508_v36, %v505_v39 }
 0x162   : > { %v594_v8 = vpop.permute.xlu1 %593 }
 0x163   : > { %905 = vtanh.f32 %v510_v40 }
 0x167   : > { %v614_v9 = vpop.permute.xlu1 %613 }
 0x16c   : > { %v624_v11 = vpop.permute.xlu1 %623 }
 0x16d   : > { %v906_v44 = vpop.eup %905 }
 0x16e   : > { %v531_v46 = vrot.slane %v906_v44, %v1275_v20  ;;  %v541_v47 = vrot.slane %v906_v44, %v1279_v23  ;;  %v522_v48 = vrot.slane %v906_v44, %v1272_v19  ;;  %v551_v52 = vrot.slane %v906_v44, %v1282_v25 }
 0x16f   : > { %v561_v56 = vrot.slane %v906_v44, %v1301_v49  ;;  %v571_v60 = vrot.slane %v906_v44, %v1309_v58 }
 0x170   : > { %v532_v50 = vmul.f32 %v531_v46, %v526_v41  ;;  %v523_v51 = vmul.f32 %v522_v48, %v517_v43  ;;  %v542_v55 = vmul.f32 %v541_v47, %v536_v42  ;;  %v552_v63 = vmul.f32 %v551_v52, %v546_v53 }
 0x171   : > { %v562_v0 = vmul.f32 %v561_v56, %v556_v45  ;;  %v572_v3 = vmul.f32 %v571_v60, %v566_v59  ;;  %v644_v27 = vpop.permute.xlu1 %643 }
 0x172   : > { %v533_v57 = vadd.f32 %v532_v50, %v523_v51 }
 0x174   : > { %v543_v61 = vadd.f32 %v542_v55, %v533_v57 }
 0x176   : > { %v553_v1 = vadd.f32 %v552_v63, %v543_v61  ;;  %v654_v33 = vpop.permute.xlu1 %653 }
 0x178   : > { %v563_v4 = vadd.f32 %v562_v0, %v553_v1 }
 0x17a   : > { %v573_v6 = vadd.f32 %v572_v3, %v563_v4 }
 0x17c   : > { %v578_v7 = vadd.f32 %v576_v5, %v573_v6 }
 0x17e   : > { %907 = vtanh.f32 %v578_v7 }
 0x188   : > { %v908_v10 = vpop.eup %907 }
 0x189   : > { %v590_v12 = vrot.slane %v908_v10, %v1272_v19  ;;  %v599_v13 = vrot.slane %v908_v10, %v1275_v20  ;;  %v609_v14 = vrot.slane %v908_v10, %v1279_v23  ;;  %v619_v17 = vrot.slane %v908_v10, %v1282_v25 }
 0x18a   : > { %v629_v22 = vrot.slane %v908_v10, %v1301_v49  ;;  %v639_v19 = vrot.slane %v908_v10, %v1309_v58  ;;  %v649_v23 = vrot.slane %v908_v10, %v290_v54  ;;  %v659_v25 = vrot.slane %v908_v10, %v300_v62 }
 0x18b   : > { %v591_v16 = vmul.f32 %v590_v12, %v585_v2  ;;  %v600_v21 = vmul.f32 %v599_v13, %v594_v8  ;;  %v610_v26 = vmul.f32 %v609_v14, %v604_v15  ;;  %v620_v28 = vmul.f32 %v619_v17, %v614_v9 }
 0x18c   : > { %v630_v20 = vmul.f32 %v629_v22, %v624_v11  ;;  %v640_v49 = vmul.f32 %v639_v19, %v634_v30  ;;  %v650_v34 = vmul.f32 %v649_v23, %v644_v27  ;;  %v660_v36 = vmul.f32 %v659_v25, %v654_v33 }
 0x18d   : > { %v601_v24 = vadd.f32 %v600_v21, %v591_v16 }
 0x18f   : > { %v611_v29 = vadd.f32 %v610_v26, %v601_v24 }
 0x191   : > { %v621_v31 = vadd.f32 %v620_v28, %v611_v29 }
 0x193   : > { %v631_v32 = vadd.f32 %v630_v20, %v621_v31 }
 0x195   : > { %v641_v35 = vadd.f32 %v640_v49, %v631_v32 }
 0x197   : > { %v651_v37 = vadd.f32 %v650_v34, %v641_v35 }
 0x199   : > { %v661_v58 = vadd.f32 %v660_v36, %v651_v37 }
 0x19b   : > { %v666_v54 = vadd.f32 %v664_v38, %v661_v58 }
 0x19d   : > { %667 = vst [vmem:[%s173_s17] sm:$0xf] %v666_v54 }
 0x19e   : > { %980 = shalt.err (!%p977_p7)
}
 0x19f   : > { %s981_s6 = scalar_lea.hbm %s1358_s28, 64  ;;  %s985_s24 = scalar_lea.hbm %s1404_s2, 128 }
 0x1a0   : > { %p982_p9 = scmp.ne.s32.totalorder %s1358_s28, %s981_s6  ;;  %p986_p0 = scmp.lt.u32.totalorder %s1358_s28, %s1404_s2 }
 0x1a1   : > { %p987_p11 = scmp.lt.u32.totalorder %s985_s24, %s981_s6  ;;  %p989_p4 = scmp.lt.u32.totalorder %s981_s6, %s1358_s28 }
 0x1a2   : > { %p983_p2 = pnand %p982_p9, %p1159_p12 }
 0x1a3   : > { %p988_p1 = por %p987_p11, %p986_p0 }
 0x1a4   : > { %p984_p5 = pneg %p983_p2 }
 0x1a5   : > { %p990_p6 = por %p989_p4, %p988_p1 }
 0x1a7   : > { %p991_p8 = pnand %p990_p6, %p984_p5 }
 0x1a9   : > { %994 = shalt.err (!%p991_p8)
}
 0x1aa   : > { %782 = dma.vmem_to_hbm [thread:$0]  (%p1159_p12), %s1360_s27, 64, %s1358_s28, %s669_s30  }
 0x1ab PF: > { %s694_s26 = sand.u32 1, %s1025_s9   ;;  %p1419_p10 = scmp.ne.s32.totalorder %s1409_s16, 0 }
 0x1ac   : > { %p1420_p13 = scmp.ge.s32.totalorder %s1037_s12, 2  ;;  %s695_s19 = scalar_lea.sflag [#allocation4], %s694_s26 }
 0x1ae   : > { %p793_p3 = pnand %p1420_p13, %p1419_p10 }
 0x1b0   : > { %1020 = dma.done.wait (!%p793_p3), %s695_s19, 64  }
 0x1b1   : > { %1022 = vsyncadd (!%p793_p3), %s695_s19, 4294967232  ;;  %p16_p7 = scmp.ge.s32.totalorder %s1124_s21, 4   ;;  %s1421_s9 = smov %s1029_s10 }
 0x1b2   : > { %s1422_s10 = smov %s1033_s11  ;;  %s1423_s11 = smov %s1155_s8 }
 0x1b3   : > { %s1424_s12 = smov %s1124_s21  ;;  %18 = sbr.rel (!%p16_p7) target bundleno = 6 (0x6), region = 84 }
 0x1ba   :  { %700 = vsyncpa [#allocation3], 1 }
 0x1bb   :  { %702 = vsyncpa [#allocation3 + $0x1], 1 }
 0x1bc   :  { %703 = vsyncpa [#allocation6], 1 }
 0x1bd   :  { %704 = vsyncpa [#allocation4], 1 }
 0x1be   :  { %706 = vsyncpa [#allocation4 + $0x1], 1 }

</bundles_post_ra>
